<compile_context>
chip_gen: v5e
topology: v5e:2x2
jax: 0.10.0
libtpu: 0.0.40
codegen_flags: <defaults>
</compile_context>

<pallas_src>
import functools

import jax
import jax.numpy as jnp
from jax.experimental import pallas as pl
from jax.experimental.pallas import tpu as pltpu


def _conv_relu_kernel(x_ref, w_ref, b_ref, o_ref, *, kh, kw, wp, stride,
                      s_pad, nb):
    """Fused conv + bias + ReLU for `nb` images.

    x_ref: (nb, C, L)        zero-padded input, flattened over (rows, WP), bf16
    w_ref: (OC, KH*KW*C)     conv weight, tap-major / channel-minor, bf16
    b_ref: (OC, 1)           bias, f32
    o_ref: (nb, OC, S_pad)   S_pad = 128-aligned OH*WP flattened spatial, f32
    """
    cols = []
    for b in range(nb):                       # static unroll over images
        taps = []
        for t in range(kh * kw):              # static unroll over taps
            i, j = divmod(t, kw)
            d = i * wp + j                     # flat offset of this tap
            if stride == 1:
                taps.append(x_ref[b, :, pl.ds(d, s_pad)])              # (C, S)
            else:
                # TODO(synk): stride>1 uses lane-strided reads; only stride==1
                # is exercised below -- compact columns first if this matters.
                taps.append(x_ref[b, :, pl.ds(d, s_pad, stride=stride)])
        cols.append(jnp.concatenate(taps, axis=0))      # (KH*KW*C, S)
    patches = cols[0] if nb == 1 else jnp.concatenate(cols, axis=1)

    # Single deep MXU push: (OC, K) x (K, nb*S) with K = KH*KW*C.
    acc = jnp.dot(w_ref[...], patches, preferred_element_type=jnp.float32)
    acc += b_ref[...]                          # (OC, 1) broadcasts along lanes
    y = jnp.maximum(acc, 0.0).astype(o_ref.dtype)
    for b in range(nb):
        o_ref[b] = y[:, b * s_pad:(b + 1) * s_pad]


def _pick_batch_per_step(n):
    """Images per grid step: 2 'parallel' steps on 2-TC v7x, else one step."""
    try:
        kind = jax.devices()[0].device_kind.lower()
    except Exception:
        kind = ""
    two_tensorcores = "7" in kind              # v7x has 2 TensorCores / chip
    n_steps = 2 if (two_tensorcores and n >= 2) else 1
    return pl.cdiv(n, n_steps)


@functools.partial(jax.jit, static_argnames=("stride", "padding"))
def basic_conv2d(x, weight, bias, *, stride, padding):
    """relu(conv2d(x, weight, bias, stride, padding)); x NCHW, weight (OC,C,KH,KW)."""
    n, c, h, w = x.shape
    oc, _, kh, kw = weight.shape
    hp, wp = h + 2 * padding, w + 2 * padding
    oh = (hp - kh) // stride + 1
    ow = (wp - kw) // stride + 1

    # Outputs are computed over the full padded-width grid (OH x WP); the lane
    # dim is rounded up to 128 for unmasked stores.  Junk lanes/columns are
    # sliced off afterwards.
    s_out = oh * wp
    s_pad = pl.cdiv(s_out, 128) * 128
    d_max = (kh - 1) * wp + (kw - 1)
    l_need = stride * (s_pad - 1) + d_max + 1
    rows = max(hp, pl.cdiv(l_need, wp))        # extra zero rows at the bottom
    l_tot = rows * wp

    nb = _pick_batch_per_step(n)
    n_pad = pl.cdiv(n, nb) * nb

    # One fused pad of the bf16 input (batch pad + spatial zero-pad + extra
    # bottom rows so every shifted window read stays in-bounds), then a free
    # contiguous flatten to (N, C, rows*WP).
    xf = jnp.pad(x.astype(jnp.bfloat16),
                 ((0, n_pad - n), (0, 0),
                  (padding, rows - h - padding), (padding, padding)))
    xf = xf.reshape(n_pad, c, l_tot)

    # (OC, C, KH, KW) -> (OC, KH*KW*C): tap-major / channel-minor, matching the
    # sublane order of the in-kernel patch matrix.
    w2 = weight.transpose(0, 2, 3, 1).reshape(oc, kh * kw * c).astype(jnp.bfloat16)
    b2 = bias.reshape(oc, 1).astype(jnp.float32)

    kernel = functools.partial(_conv_relu_kernel, kh=kh, kw=kw, wp=wp,
                               stride=stride, s_pad=s_pad, nb=nb)

    flops = 2 * n_pad * oc * (kh * kw * c) * s_pad
    bytes_accessed = (xf.size * xf.dtype.itemsize
                      + w2.size * w2.dtype.itemsize
                      + b2.size * 4
                      + n_pad * oc * s_pad * 4)

    out_flat = pl.pallas_call(
        kernel,
        out_shape=jax.ShapeDtypeStruct((n_pad, oc, s_pad), jnp.float32),
        grid_spec=pltpu.PrefetchScalarGridSpec(
            num_scalar_prefetch=0,
            grid=(n_pad // nb,),
            in_specs=[
                pl.BlockSpec((nb, c, l_tot), lambda i: (i, 0, 0)),
                pl.BlockSpec((oc, kh * kw * c), lambda i: (0, 0)),
                pl.BlockSpec((oc, 1), lambda i: (0, 0)),
            ],
            out_specs=pl.BlockSpec((nb, oc, s_pad), lambda i: (i, 0, 0)),
        ),
        compiler_params=pltpu.CompilerParams(
            dimension_semantics=("parallel",)),
        cost_estimate=pl.CostEstimate(
            flops=flops, transcendentals=0, bytes_accessed=bytes_accessed),
    )(xf, w2, b2)

    # Drop lane-alignment junk, free contiguous reshape, drop the (WP - OW)
    # junk columns per output row.  Result is already NCHW.
    out = out_flat[:n, :, :s_out].reshape(n, oc, oh, wp)[:, :, :, :ow]
    return out.astype(x.dtype)


def _init_params(key, in_channel, out_channel, size):
    """Deterministic Conv2d-style init (uniform +-1/sqrt(fan_in))."""
    kw_, kb = jax.random.split(key)
    fan_in = in_channel * size * size
    bound = 1.0 / jnp.sqrt(float(fan_in))
    weight = jax.random.uniform(
        kw_, (out_channel, in_channel, size, size), jnp.float32, -bound, bound)
    bias = jax.random.uniform(kb, (out_channel,), jnp.float32, -bound, bound)
    return weight, bias


if __name__ == "__main__":
    # BasicConv2d(in_channel=4, out_channel=8, size=3, stride=1, padding=1)
    key = jax.random.PRNGKey(0)
    kx, kp = jax.random.split(key)

    in_channel, out_channel, size, stride, padding = 4, 8, 3, 1, 1
    x = jax.random.normal(kx, (2, in_channel, 16, 16), jnp.float32)  # NCHW
    weight, bias = _init_params(kp, in_channel, out_channel, size)

    y = basic_conv2d(x, weight, bias, stride=stride, padding=padding)
    jax.block_until_ready(y)
    assert y.shape == (2, out_channel, 16, 16)

    # Tight check against a reference using the same bf16 operand rounding
    # (isolates the kernel's indexing/accumulation logic).
    xb = x.astype(jnp.bfloat16).astype(jnp.float32)
    wb = weight.astype(jnp.bfloat16).astype(jnp.float32)
    ref_b = jax.lax.conv_general_dilated(
        xb, wb, window_strides=(stride, stride),
        padding=((padding, padding), (padding, padding)),
        dimension_numbers=("NCHW", "OIHW", "NCHW"),
    ) + bias.reshape(1, out_channel, 1, 1)
    ref_b = jnp.maximum(ref_b, 0.0)
    assert jnp.allclose(y, ref_b, atol=1e-4, rtol=1e-4), "mismatch vs bf16-matched ref"

    # Loose sanity check against the exact f32 conv (bf16 MXU operands).
    ref = jax.lax.conv_general_dilated(
        x, weight, window_strides=(stride, stride),
        padding=((padding, padding), (padding, padding)),
        dimension_numbers=("NCHW", "OIHW", "NCHW"),
    ) + bias.reshape(1, out_channel, 1, 1)
    ref = jnp.maximum(ref, 0.0)
    assert jnp.allclose(y, ref, atol=5e-2, rtol=5e-2), "mismatch vs f32 reference conv"

    print("KERNEL_OK")
</pallas_src>

<mosaic_0001>
module attributes {stable_mosaic.version = 11 : i64} {
  func.func @_conv_relu_kernel(%arg0: i32, %arg1: memref<2x4x432xbf16, #tpu.memory_space<vmem>>, %arg2: memref<8x36xbf16, #tpu.memory_space<vmem>>, %arg3: memref<8x1xf32, #tpu.memory_space<vmem>>, %arg4: memref<2x8x384xf32, #tpu.memory_space<vmem>>) attributes {dimension_semantics = [#tpu.dimension_semantics<parallel>], iteration_bounds = array<i64: 1>, scalar_prefetch = 0 : i64, scratch_operands = 0 : i64, tpu.core_type = #tpu.core_type<tc>, window_params = [{transform_indices = @transform_0, window_bounds = array<i64: 2, 4, 432>}, {pipeline_mode = #tpu.pipeline_mode<synchronous>, transform_indices = @transform_1, window_bounds = array<i64: 8, 36>}, {pipeline_mode = #tpu.pipeline_mode<synchronous>, transform_indices = @transform_2, window_bounds = array<i64: 8, 1>}, {transform_indices = @transform_3, window_bounds = array<i64: 2, 8, 384>}]} {
    %c0 = arith.constant 0 : index
    %c0_0 = arith.constant 0 : index
    %c0_1 = arith.constant 0 : index
    %0 = vector.load %arg1[%c0, %c0_0, %c0_1] : memref<2x4x432xbf16, #tpu.memory_space<vmem>>, vector<1x4x384xbf16>
    %1 = vector.shape_cast %0 : vector<1x4x384xbf16> to vector<4x384xbf16>
    %c0_2 = arith.constant 0 : index
    %c0_3 = arith.constant 0 : index
    %c1 = arith.constant 1 : index
    %2 = vector.load %arg1[%c0_2, %c0_3, %c1] : memref<2x4x432xbf16, #tpu.memory_space<vmem>>, vector<1x4x384xbf16>
    %3 = vector.shape_cast %2 : vector<1x4x384xbf16> to vector<4x384xbf16>
    %c0_4 = arith.constant 0 : index
    %c0_5 = arith.constant 0 : index
    %c2 = arith.constant 2 : index
    %4 = vector.load %arg1[%c0_4, %c0_5, %c2] : memref<2x4x432xbf16, #tpu.memory_space<vmem>>, vector<1x4x384xbf16>
    %5 = vector.shape_cast %4 : vector<1x4x384xbf16> to vector<4x384xbf16>
    %c0_6 = arith.constant 0 : index
    %c0_7 = arith.constant 0 : index
    %c18 = arith.constant 18 : index
    %6 = vector.load %arg1[%c0_6, %c0_7, %c18] : memref<2x4x432xbf16, #tpu.memory_space<vmem>>, vector<1x4x384xbf16>
    %7 = vector.shape_cast %6 : vector<1x4x384xbf16> to vector<4x384xbf16>
    %c0_8 = arith.constant 0 : index
    %c0_9 = arith.constant 0 : index
    %c19 = arith.constant 19 : index
    %8 = vector.load %arg1[%c0_8, %c0_9, %c19] : memref<2x4x432xbf16, #tpu.memory_space<vmem>>, vector<1x4x384xbf16>
    %9 = vector.shape_cast %8 : vector<1x4x384xbf16> to vector<4x384xbf16>
    %c0_10 = arith.constant 0 : index
    %c0_11 = arith.constant 0 : index
    %c20 = arith.constant 20 : index
    %10 = vector.load %arg1[%c0_10, %c0_11, %c20] : memref<2x4x432xbf16, #tpu.memory_space<vmem>>, vector<1x4x384xbf16>
    %11 = vector.shape_cast %10 : vector<1x4x384xbf16> to vector<4x384xbf16>
    %c0_12 = arith.constant 0 : index
    %c0_13 = arith.constant 0 : index
    %c36 = arith.constant 36 : index
    %12 = vector.load %arg1[%c0_12, %c0_13, %c36] : memref<2x4x432xbf16, #tpu.memory_space<vmem>>, vector<1x4x384xbf16>
    %13 = vector.shape_cast %12 : vector<1x4x384xbf16> to vector<4x384xbf16>
    %c0_14 = arith.constant 0 : index
    %c0_15 = arith.constant 0 : index
    %c37 = arith.constant 37 : index
    %14 = vector.load %arg1[%c0_14, %c0_15, %c37] : memref<2x4x432xbf16, #tpu.memory_space<vmem>>, vector<1x4x384xbf16>
    %15 = vector.shape_cast %14 : vector<1x4x384xbf16> to vector<4x384xbf16>
    %c0_16 = arith.constant 0 : index
    %c0_17 = arith.constant 0 : index
    %c38 = arith.constant 38 : index
    %16 = vector.load %arg1[%c0_16, %c0_17, %c38] : memref<2x4x432xbf16, #tpu.memory_space<vmem>>, vector<1x4x384xbf16>
    %17 = vector.shape_cast %16 : vector<1x4x384xbf16> to vector<4x384xbf16>
    %18 = tpu.concatenate %1, %3, %5, %7, %9, %11, %13, %15, %17 in 0 : vector<4x384xbf16>, vector<4x384xbf16>, vector<4x384xbf16>, vector<4x384xbf16>, vector<4x384xbf16>, vector<4x384xbf16>, vector<4x384xbf16>, vector<4x384xbf16>, vector<4x384xbf16> -> vector<36x384xbf16>
    %c1_18 = arith.constant 1 : index
    %c0_19 = arith.constant 0 : index
    %c0_20 = arith.constant 0 : index
    %19 = vector.load %arg1[%c1_18, %c0_19, %c0_20] : memref<2x4x432xbf16, #tpu.memory_space<vmem>>, vector<1x4x384xbf16>
    %20 = vector.shape_cast %19 : vector<1x4x384xbf16> to vector<4x384xbf16>
    %c1_21 = arith.constant 1 : index
    %c0_22 = arith.constant 0 : index
    %c1_23 = arith.constant 1 : index
    %21 = vector.load %arg1[%c1_21, %c0_22, %c1_23] : memref<2x4x432xbf16, #tpu.memory_space<vmem>>, vector<1x4x384xbf16>
    %22 = vector.shape_cast %21 : vector<1x4x384xbf16> to vector<4x384xbf16>
    %c1_24 = arith.constant 1 : index
    %c0_25 = arith.constant 0 : index
    %c2_26 = arith.constant 2 : index
    %23 = vector.load %arg1[%c1_24, %c0_25, %c2_26] : memref<2x4x432xbf16, #tpu.memory_space<vmem>>, vector<1x4x384xbf16>
    %24 = vector.shape_cast %23 : vector<1x4x384xbf16> to vector<4x384xbf16>
    %c1_27 = arith.constant 1 : index
    %c0_28 = arith.constant 0 : index
    %c18_29 = arith.constant 18 : index
    %25 = vector.load %arg1[%c1_27, %c0_28, %c18_29] : memref<2x4x432xbf16, #tpu.memory_space<vmem>>, vector<1x4x384xbf16>
    %26 = vector.shape_cast %25 : vector<1x4x384xbf16> to vector<4x384xbf16>
    %c1_30 = arith.constant 1 : index
    %c0_31 = arith.constant 0 : index
    %c19_32 = arith.constant 19 : index
    %27 = vector.load %arg1[%c1_30, %c0_31, %c19_32] : memref<2x4x432xbf16, #tpu.memory_space<vmem>>, vector<1x4x384xbf16>
    %28 = vector.shape_cast %27 : vector<1x4x384xbf16> to vector<4x384xbf16>
    %c1_33 = arith.constant 1 : index
    %c0_34 = arith.constant 0 : index
    %c20_35 = arith.constant 20 : index
    %29 = vector.load %arg1[%c1_33, %c0_34, %c20_35] : memref<2x4x432xbf16, #tpu.memory_space<vmem>>, vector<1x4x384xbf16>
    %30 = vector.shape_cast %29 : vector<1x4x384xbf16> to vector<4x384xbf16>
    %c1_36 = arith.constant 1 : index
    %c0_37 = arith.constant 0 : index
    %c36_38 = arith.constant 36 : index
    %31 = vector.load %arg1[%c1_36, %c0_37, %c36_38] : memref<2x4x432xbf16, #tpu.memory_space<vmem>>, vector<1x4x384xbf16>
    %32 = vector.shape_cast %31 : vector<1x4x384xbf16> to vector<4x384xbf16>
    %c1_39 = arith.constant 1 : index
    %c0_40 = arith.constant 0 : index
    %c37_41 = arith.constant 37 : index
    %33 = vector.load %arg1[%c1_39, %c0_40, %c37_41] : memref<2x4x432xbf16, #tpu.memory_space<vmem>>, vector<1x4x384xbf16>
    %34 = vector.shape_cast %33 : vector<1x4x384xbf16> to vector<4x384xbf16>
    %c1_42 = arith.constant 1 : index
    %c0_43 = arith.constant 0 : index
    %c38_44 = arith.constant 38 : index
    %35 = vector.load %arg1[%c1_42, %c0_43, %c38_44] : memref<2x4x432xbf16, #tpu.memory_space<vmem>>, vector<1x4x384xbf16>
    %36 = vector.shape_cast %35 : vector<1x4x384xbf16> to vector<4x384xbf16>
    %37 = tpu.concatenate %20, %22, %24, %26, %28, %30, %32, %34, %36 in 0 : vector<4x384xbf16>, vector<4x384xbf16>, vector<4x384xbf16>, vector<4x384xbf16>, vector<4x384xbf16>, vector<4x384xbf16>, vector<4x384xbf16>, vector<4x384xbf16>, vector<4x384xbf16> -> vector<36x384xbf16>
    %38 = tpu.concatenate %18, %37 in 1 : vector<36x384xbf16>, vector<36x384xbf16> -> vector<36x768xbf16>
    %c0_45 = arith.constant 0 : index
    %c0_46 = arith.constant 0 : index
    %39 = vector.load %arg2[%c0_45, %c0_46] : memref<8x36xbf16, #tpu.memory_space<vmem>>, vector<8x36xbf16>
    %cst = arith.constant dense<0.000000e+00> : vector<8x768xf32>
    %40 = tpu.matmul %39, %38, %cst {dimension_numbers = #tpu.dot_dimension_numbers<[1], [0], [0], [1], [0, 0, 1, 1], [], []>} : vector<8x36xbf16>, vector<36x768xbf16>, vector<8x768xf32> -> vector<8x768xf32>
    %c0_47 = arith.constant 0 : index
    %c0_48 = arith.constant 0 : index
    %41 = vector.load %arg3[%c0_47, %c0_48] : memref<8x1xf32, #tpu.memory_space<vmem>>, vector<8x1xf32>
    %42 = vector.broadcast %41 : vector<8x1xf32> to vector<8x768xf32>
    %43 = arith.addf %40, %42 : vector<8x768xf32>
    %cst_49 = arith.constant 0.000000e+00 : f32
    %44 = vector.broadcast %cst_49 : f32 to vector<8x768xf32>
    %45 = arith.maximumf %43, %44 : vector<8x768xf32>
    %46 = vector.extract_strided_slice %45 {offsets = [0, 0], sizes = [8, 384], strides = [1, 1]} : vector<8x768xf32> to vector<8x384xf32>
    %c0_50 = arith.constant 0 : index
    %c0_51 = arith.constant 0 : index
    %c0_52 = arith.constant 0 : index
    %47 = vector.load %arg4[%c0_50, %c0_51, %c0_52] : memref<2x8x384xf32, #tpu.memory_space<vmem>>, vector<1x8x384xf32>
    %48 = vector.shape_cast %47 : vector<1x8x384xf32> to vector<8x384xf32>
    %49 = vector.shape_cast %46 : vector<8x384xf32> to vector<1x8x384xf32>
    tpu.vector_store %arg4[%c0_50, %c0_51, %c0_52], %49 {strides = array<i32>} : memref<2x8x384xf32, #tpu.memory_space<vmem>>, vector<1x8x384xf32>,
    %50 = vector.extract_strided_slice %45 {offsets = [0, 384], sizes = [8, 384], strides = [1, 1]} : vector<8x768xf32> to vector<8x384xf32>
    %c1_53 = arith.constant 1 : index
    %c0_54 = arith.constant 0 : index
    %c0_55 = arith.constant 0 : index
    %51 = vector.load %arg4[%c1_53, %c0_54, %c0_55] : memref<2x8x384xf32, #tpu.memory_space<vmem>>, vector<1x8x384xf32>
    %52 = vector.shape_cast %51 : vector<1x8x384xf32> to vector<8x384xf32>
    %53 = vector.shape_cast %50 : vector<8x384xf32> to vector<1x8x384xf32>
    tpu.vector_store %arg4[%c1_53, %c0_54, %c0_55], %53 {strides = array<i32>} : memref<2x8x384xf32, #tpu.memory_space<vmem>>, vector<1x8x384xf32>,
    return
  }
  func.func @transform_0(%arg0: i32) -> (i32, i32, i32) {
    %c0_i32 = arith.constant 0 : i32
    %c0_i32_0 = arith.constant 0 : i32
    %c0_i32_1 = arith.constant 0 : i32
    return %arg0, %c0_i32, %c0_i32_0 : i32, i32, i32
  }
  func.func @transform_1(%arg0: i32) -> (i32, i32) {
    %c0_i32 = arith.constant 0 : i32
    %c0_i32_0 = arith.constant 0 : i32
    %c0_i32_1 = arith.constant 0 : i32
    return %c0_i32, %c0_i32_0 : i32, i32
  }
  func.func @transform_2(%arg0: i32) -> (i32, i32) {
    %c0_i32 = arith.constant 0 : i32
    %c0_i32_0 = arith.constant 0 : i32
    %c0_i32_1 = arith.constant 0 : i32
    return %c0_i32, %c0_i32_0 : i32, i32
  }
  func.func @transform_3(%arg0: i32) -> (i32, i32, i32) {
    %c0_i32 = arith.constant 0 : i32
    %c0_i32_0 = arith.constant 0 : i32
    %c0_i32_1 = arith.constant 0 : i32
    return %arg0, %c0_i32, %c0_i32_0 : i32, i32, i32
  }
}

</mosaic_0001>

<bundles_post_ra>
// kernel: basic_conv2d.1
= control target key start
LH: loop header
LB: loop body
LE: loop exit
PB: predicated region body
PF: predicated region fallthrough
CT: control target
= control target key end

     0   :  { %s611_s16 = smov 127   ;;  %s612_s17 = smov 126   ;;  %vm41_vm0 = vcmask 1039360   ;;  %vm128_vm1 = vcmask 883712   ;;  %vm193_vm2 = vcmask 736256   ;;  %vm197_vm3 = vcmask 1041408   ;;  %s993_s0 = inlined_call_operand.vmem [shape: bf16[2,4,432], index: 0, kind: input, shape index: {}]   ;;  %s994_s1 = inlined_call_operand.vmem [shape: bf16[8,36], index: 1, kind: input, shape index: {}]   ;;  %s995_s2 = inlined_call_operand.vmem [shape: f32[8,1], index: 2, kind: input, shape index: {}]   ;;  %s996_s3 = inlined_call_operand.vmem [shape: f32[2,8,384], index: 3, kind: output, shape index: {}]  }
   0x1   :  { %v15_v0 = vld [vmem:[%s993_s0] sm:$0x3f]  ;;  %s613_s18 = smov 110   ;;  %s614_s19 = smov 109   ;;  %v589_v33 = vld [vmem:[%s993_s0 + $0x8] sm:$0x3f] }
   0x2   :  { %18 = vst [vmem:[#allocation1] ss:$4 sm:$0xff] %v15_v0  ;;  %v646_v1 = vld [vmem:[%s993_s0] sm:$0xff]  ;;  %s615_s20 = smov 108   ;;  %s616_s21 = smov 92   ;;  %v698_v38 = vld [vmem:[%s993_s0 + $0x8] sm:$0xff] }
   0x3   :  { %s617_s22 = smov 91   ;;  %s618_s25 = smov 90   ;;  %vm106_vm4 = vcmask 891904   ;;  %vm150_vm5 = vcmask 752640   ;;  %vm172_vm6 = vcmask 744448   ;;  %vm63_vm7 = vcmask 1031168  }
   0x4   :  { %vm85_vm8 = vcmask 900096   ;;  %vm204_vm9 = vcmask 1043456   ;;  %vm211_vm10 = vcmask 1045504   ;;  %vm472_vm11 = vcmask 293888  }
   0x9   :  { %v648_v2 = vld.sshfl [vmem:[#allocation1] sm:$0xff pattern:$0x73625140]  ;;  %v650_v3 = vld.sshfl [vmem:[#allocation1 + $0x8] sm:$0xff pattern:$0x73625140] }
   0xa   :  { %v652_v4 = vld.sshfl [vmem:[#allocation1 + $0x10] sm:$0xff pattern:$0x73625140] }
   0xb   :  { %24 = vst [vmem:[#allocation1 + $0x1] ss:$4 sm:$0xff] %v646_v1 }
  0x12   :  { %v29_v5 = vld.sshfl [vmem:[#allocation1 + $0x10] sm:$0xff pattern:$0x73625140]  ;;  %v655_v6 = vld.sshfl [vmem:[#allocation1 + $0x18] sm:$0xff pattern:$0x73625140] }
  0x13   :  { %37 = vrot.lane.b32.xlu2 %v29_v5, %s611_s16  ;;  %v27_v7 = vld.sshfl [vmem:[#allocation1 + $0x8] sm:$0xff pattern:$0x73625140]  ;;  %v25_v8 = vld.sshfl [vmem:[#allocation1] sm:$0xff pattern:$0x73625140] }
  0x14   :  { %35 = vrot.lane.b32.xlu1 %v27_v7, %s611_s16  ;;  %33 = vrot.lane.b32.xlu0 %v25_v8, %s611_s16  ;;  %46 = vst [vmem:[#allocation1 + $0x2] ss:$4 sm:$0xff] %v646_v1 }
  0x1b   :  { %v51_v9 = vld.sshfl [vmem:[#allocation1 + $0x10] sm:$0xff pattern:$0x73625140]  ;;  %v53_v10 = vld.sshfl [vmem:[#allocation1 + $0x18] sm:$0xff pattern:$0x73625140] }
  0x1c   :  { %59 = vrot.lane.b32.xlu2 %v51_v9, %s612_s17  ;;  %v49_v11 = vld.sshfl [vmem:[#allocation1 + $0x8] sm:$0xff pattern:$0x73625140]  ;;  %v47_v12 = vld.sshfl [vmem:[#allocation1] sm:$0xff pattern:$0x73625140] }
  0x1d   :  { %57 = vrot.lane.b32.xlu1 %v49_v11, %s612_s17  ;;  %55 = vrot.lane.b32.xlu0 %v47_v12, %s612_s17  ;;  %68 = vst [vmem:[#allocation1 + $0x3] ss:$4 sm:$0xff] %v646_v1 }
  0x24   :  { %v73_v13 = vld.sshfl [vmem:[#allocation1 + $0x10] sm:$0xff pattern:$0x73625140]  ;;  %v665_v14 = vld.sshfl [vmem:[#allocation1 + $0x18] sm:$0xff pattern:$0x73625140] }
  0x25   :  { %81 = vrot.lane.b32.xlu2 %v73_v13, %s613_s18  ;;  %v71_v15 = vld.sshfl [vmem:[#allocation1 + $0x8] sm:$0xff pattern:$0x73625140]  ;;  %v69_v16 = vld.sshfl [vmem:[#allocation1] sm:$0xff pattern:$0x73625140] }
  0x26   :  { %79 = vrot.lane.b32.xlu1 %v71_v15, %s613_s18  ;;  %77 = vrot.lane.b32.xlu0 %v69_v16, %s613_s18  ;;  %89 = vst [vmem:[#allocation1] ss:$4 sm:$0xff] %v646_v1 }
  0x2d   :  { %v96_v17 = vld.sshfl [vmem:[#allocation1 + $0x18] sm:$0xff pattern:$0x73625140]  ;;  %v92_v18 = vld.sshfl [vmem:[#allocation1 + $0x8] sm:$0xff pattern:$0x73625140] }
  0x2e   :  { %104 = vrot.lane.b32.xlu0 %v96_v17, %s614_s19  ;;  %100 = vrot.lane.b32.xlu2 %v92_v18, %s614_s19  ;;  %v90_v19 = vld.sshfl [vmem:[#allocation1] sm:$0xff pattern:$0x73625140]  ;;  %v94_v20 = vld.sshfl [vmem:[#allocation1 + $0x10] sm:$0xff pattern:$0x73625140] }
  0x2f   :  { %98 = vrot.lane.b32.xlu1 %v90_v19, %s614_s19  ;;  %111 = vst [vmem:[#allocation1 + $0x1] ss:$4 sm:$0xff] %v646_v1 }
  0x36   :  { %102 = vrot.lane.b32.xlu2 %v94_v20, %s614_s19  ;;  %v114_v21 = vld.sshfl [vmem:[#allocation1 + $0x8] sm:$0xff pattern:$0x73625140]  ;;  %v112_v22 = vld.sshfl [vmem:[#allocation1] sm:$0xff pattern:$0x73625140] }
  0x37   :  { %122 = vrot.lane.b32.xlu1 %v114_v21, %s615_s20  ;;  %120 = vrot.lane.b32.xlu0 %v112_v22, %s615_s20  ;;  %v116_v23 = vld.sshfl [vmem:[#allocation1 + $0x10] sm:$0xff pattern:$0x73625140]  ;;  %v118_v24 = vld.sshfl [vmem:[#allocation1 + $0x18] sm:$0xff pattern:$0x73625140] }
  0x38   :  { %133 = vst [vmem:[#allocation1 + $0x2] ss:$4 sm:$0xff] %v646_v1 }
  0x3e   :  { %124 = vrot.lane.b32.xlu2 %v116_v23, %s615_s20 }
  0x3f   :  { %126 = vrot.lane.b32.xlu1 %v118_v24, %s615_s20  ;;  %v140_v25 = vld.sshfl [vmem:[#allocation1 + $0x18] sm:$0xff pattern:$0x73625140]  ;;  %v134_v26 = vld.sshfl [vmem:[#allocation1] sm:$0xff pattern:$0x73625140] }
  0x40   :  { %142 = vrot.lane.b32.xlu0 %v134_v26, %s616_s21  ;;  %v138_v27 = vld.sshfl [vmem:[#allocation1 + $0x10] sm:$0xff pattern:$0x73625140]  ;;  %v136_v28 = vld.sshfl [vmem:[#allocation1 + $0x8] sm:$0xff pattern:$0x73625140] }
  0x41   :  { %155 = vst [vmem:[#allocation1 + $0x3] ss:$4 sm:$0xff] %v646_v1 }
  0x46   :  { %146 = vrot.lane.b32.xlu2 %v138_v27, %s616_s21 }
  0x47   :  { %144 = vrot.lane.b32.xlu1 %v136_v28, %s616_s21 }
  0x48   :  { %v162_v29 = vld.sshfl [vmem:[#allocation1 + $0x18] sm:$0xff pattern:$0x73625140]  ;;  %v156_v30 = vld.sshfl [vmem:[#allocation1] sm:$0xff pattern:$0x73625140] }
  0x49   :  { %164 = vrot.lane.b32.xlu0 %v156_v30, %s617_s22  ;;  %v160_v31 = vld.sshfl [vmem:[#allocation1 + $0x10] sm:$0xff pattern:$0x73625140]  ;;  %v158_v32 = vld.sshfl [vmem:[#allocation1 + $0x8] sm:$0xff pattern:$0x73625140] }
  0x4a   :  { %176 = vst [vmem:[#allocation1] ss:$4 sm:$0xff] %v646_v1 }
  0x4e   :  { %168 = vrot.lane.b32.xlu2 %v160_v31, %s617_s22 }
  0x4f   :  { %166 = vrot.lane.b32.xlu1 %v158_v32, %s617_s22 }
  0x51   :  { %v177_v34 = vld.sshfl [vmem:[#allocation1] sm:$0xff pattern:$0x73625140]  ;;  %v181_v35 = vld.sshfl [vmem:[#allocation1 + $0x10] sm:$0xff pattern:$0x73625140] }
  0x52   :  { %185 = vrot.lane.b32.xlu0 %v177_v34, %s618_s25  ;;  %v179_v36 = vld.sshfl [vmem:[#allocation1 + $0x8] sm:$0xff pattern:$0x73625140]  ;;  %v183_v37 = vld.sshfl [vmem:[#allocation1 + $0x18] sm:$0xff pattern:$0x73625140] }
  0x53   :  { %249 = vst [vmem:[#allocation1] ss:$4 sm:$0xff] %v589_v33 }
  0x56   :  { %61 = vrot.lane.b32.xlu2 %v53_v10, %s612_s17 }
  0x57   :  { %189 = vrot.lane.b32.xlu1 %v181_v35, %s618_s25 }
  0x5a   :  { %187 = vrot.lane.b32.xlu0 %v179_v36, %s618_s25  ;;  %v701_v39 = vld.sshfl [vmem:[#allocation1] sm:$0xff pattern:$0x73625140]  ;;  %v703_v40 = vld.sshfl [vmem:[#allocation1 + $0x8] sm:$0xff pattern:$0x73625140] }
  0x5b   :  { %v705_v41 = vld.sshfl [vmem:[#allocation1 + $0x10] sm:$0xff pattern:$0x73625140] }
  0x5c   :  { %255 = vst [vmem:[#allocation1 + $0x1] ss:$4 sm:$0xff] %v698_v38 }
  0x62   :  { %191 = vrot.lane.b32.xlu0 %v183_v37, %s618_s25 }
  0x63   :  { %v709_v42 = vld.sshfl [vmem:[#allocation1 + $0x10] sm:$0xff pattern:$0x73625140]  ;;  %v711_v43 = vld.sshfl [vmem:[#allocation1 + $0x18] sm:$0xff pattern:$0x73625140] }
  0x64   :  { %v258_v44 = vld.sshfl [vmem:[#allocation1 + $0x8] sm:$0xff pattern:$0x73625140]  ;;  %v256_v45 = vld.sshfl [vmem:[#allocation1] sm:$0xff pattern:$0x73625140] }
  0x65   :  { %266 = vrot.lane.b32.xlu2 %v258_v44, %s611_s16  ;;  %264 = vrot.lane.b32.xlu1 %v256_v45, %s611_s16  ;;  %276 = vst [vmem:[#allocation1 + $0x2] ss:$4 sm:$0xff] %v698_v38 }
  0x6a   :  { %148 = vrot.lane.b32.xlu0 %v140_v25, %s616_s21 }
  0x6c   :  { %v277_v46 = vld.sshfl [vmem:[#allocation1] sm:$0xff pattern:$0x73625140]  ;;  %v717_v47 = vld.sshfl [vmem:[#allocation1 + $0x10] sm:$0xff pattern:$0x73625140] }
  0x6d   :  { %83 = vrot.lane.b32.xlu2 %v665_v14, %s613_s18  ;;  %v721_v48 = vld.sshfl [vmem:[#allocation1 + $0x18] sm:$0xff pattern:$0x73625140]  ;;  %v279_v49 = vld.sshfl [vmem:[#allocation1 + $0x8] sm:$0xff pattern:$0x73625140]  ;;  %v725_v50 = vpop.permute.xlu2 %37 }
  0x6e   :  { %287 = vrot.lane.b32.xlu1 %v279_v49, %s612_s17  ;;  %297 = vst [vmem:[#allocation1 + $0x3] ss:$4 sm:$0xff] %v698_v38 }
  0x72   :  { %170 = vrot.lane.b32.xlu0 %v162_v29, %s617_s22 }
  0x75   :  { %v298_v51 = vld.sshfl [vmem:[#allocation1] sm:$0xff pattern:$0x73625140]  ;;  %v728_v52 = vld.sshfl [vmem:[#allocation1 + $0x10] sm:$0xff pattern:$0x73625140] }
  0x76   :  { %v730_v53 = vld.sshfl [vmem:[#allocation1 + $0x18] sm:$0xff pattern:$0x73625140]  ;;  %v300_v54 = vld.sshfl [vmem:[#allocation1 + $0x8] sm:$0xff pattern:$0x73625140]  ;;  %v734_v55 = vpop.permute.xlu2 %59 }
  0x77   :  { %308 = vrot.lane.b32.xlu1 %v300_v54, %s613_s18  ;;  %317 = vst [vmem:[#allocation1] ss:$4 sm:$0xff] %v698_v38 }
  0x7a   :  { %39 = vrot.lane.b32.xlu0 %v655_v6, %s611_s16 }
  0x7e   :  { %v320_v56 = vld.sshfl [vmem:[#allocation1 + $0x8] sm:$0xff pattern:$0x73625140]  ;;  %v324_v57 = vld.sshfl [vmem:[#allocation1 + $0x18] sm:$0xff pattern:$0x73625140] }
  0x7f   :  { %v318_v58 = vld.sshfl [vmem:[#allocation1] sm:$0xff pattern:$0x73625140]  ;;  %v322_v59 = vld.sshfl [vmem:[#allocation1 + $0x10] sm:$0xff pattern:$0x73625140]  ;;  %v741_v60 = vpop.permute.xlu2 %81 }
  0x80   :  { %326 = vrot.lane.b32.xlu2 %v318_v58, %s614_s19  ;;  %338 = vst [vmem:[#allocation1 + $0x1] ss:$4 sm:$0xff] %v698_v38 }
  0x82   :  { %285 = vrot.lane.b32.xlu0 %v277_v46, %s612_s17 }
  0x86   :  { %v743_v61 = vpop.permute.xlu1 %35  ;;  %v34_v62 = vpop.permute.xlu0 %33 }
  0x87   :  { %v339_v63 = vld.sshfl [vmem:[#allocation1] sm:$0xff pattern:$0x73625140]  ;;  %v341_v0 = vld.sshfl [vmem:[#allocation1 + $0x8] sm:$0xff pattern:$0x73625140]  ;;  %v747_v1 = vsel %vm41_vm0, %v34_v62, %v743_v61 }
  0x88   :  { %330 = vrot.lane.b32.xlu2 %v322_v59, %s614_s19  ;;  %347 = vrot.lane.b32.xlu1 %v339_v63, %s615_s20  ;;  %v343_v5 = vld.sshfl [vmem:[#allocation1 + $0x10] sm:$0xff pattern:$0x73625140]  ;;  %v345_v6 = vld.sshfl [vmem:[#allocation1 + $0x18] sm:$0xff pattern:$0x73625140]  ;;  %v753_v7 = vpop.permute.xlu2 %100 }
  0x89   :  { %359 = vst [vmem:[#allocation1 + $0x2] ss:$4 sm:$0xff] %v698_v38 }
  0x8a   :  { %328 = vrot.lane.b32.xlu0 %v320_v56, %s614_s19 }
  0x8f   :  { %v755_v8 = vpop.permute.xlu1 %57  ;;  %v757_v9 = vpop.permute.xlu0 %55 }
  0x90   :  { %349 = vrot.lane.b32.xlu2 %v341_v0, %s615_s20  ;;  %351 = vrot.lane.b32.xlu1 %v343_v5, %s615_s20  ;;  %v360_v10 = vld.sshfl [vmem:[#allocation1] sm:$0xff pattern:$0x73625140]  ;;  %v362_v11 = vld.sshfl [vmem:[#allocation1 + $0x8] sm:$0xff pattern:$0x73625140]  ;;  %v763_v14 = vpop.permute.xlu2 %102 }
  0x91   :  { %v366_v12 = vld.sshfl [vmem:[#allocation1 + $0x18] sm:$0xff pattern:$0x73625140]  ;;  %v364_v13 = vld.sshfl [vmem:[#allocation1 + $0x10] sm:$0xff pattern:$0x73625140] }
  0x92   :  { %306 = vrot.lane.b32.xlu0 %v298_v51, %s613_s18  ;;  %380 = vst [vmem:[#allocation1 + $0x3] ss:$4 sm:$0xff] %v698_v38 }
  0x98   :  { %353 = vrot.lane.b32.xlu2 %v345_v6, %s615_s20  ;;  %368 = vrot.lane.b32.xlu1 %v360_v10, %s616_s21  ;;  %v767_v15 = vpop.permute.xlu1 %79  ;;  %v769_v16 = vpop.permute.xlu0 %77  ;;  %v65_v6 = vsel %vm63_vm7, %v755_v8, %v734_v55 }
  0x99   :  { %v387_v17 = vld.sshfl [vmem:[#allocation1 + $0x18] sm:$0xff pattern:$0x73625140]  ;;  %v383_v18 = vld.sshfl [vmem:[#allocation1 + $0x8] sm:$0xff pattern:$0x73625140]  ;;  %v775_v21 = vpop.permute.xlu2 %124 }
  0x9a   :  { %332 = vrot.lane.b32.xlu0 %v324_v57, %s614_s19  ;;  %v381_v19 = vld.sshfl [vmem:[#allocation1] sm:$0xff pattern:$0x73625140]  ;;  %v385_v20 = vld.sshfl [vmem:[#allocation1 + $0x10] sm:$0xff pattern:$0x73625140] }
  0x9b   :  { %400 = vst [vmem:[#allocation1] ss:$4 sm:$0xff] %v698_v38 }
  0xa0   :  { %370 = vrot.lane.b32.xlu2 %v362_v11, %s616_s21  ;;  %374 = vrot.lane.b32.xlu1 %v366_v12, %s616_s21  ;;  %v777_v22 = vpop.permute.xlu0 %104 }
  0xa1   :  { %v99_v23 = vpop.permute.xlu1 %98  ;;  %v782_v27 = vpop.permute.xlu2 %146 }
  0xa2   :  { %372 = vrot.lane.b32.xlu0 %v364_v13, %s616_s21  ;;  %v405_v24 = vld.sshfl [vmem:[#allocation1 + $0x10] sm:$0xff pattern:$0x73625140]  ;;  %v401_v28 = vld.sshfl [vmem:[#allocation1] sm:$0xff pattern:$0x73625140]  ;;  %v107_v46 = vsel %vm106_vm4, %v99_v23, %v753_v7  ;;  %v86_v13 = vsel %vm85_vm8, %v769_v16, %v767_v15 }
  0xa3   :  { %v403_v32 = vld.sshfl [vmem:[#allocation1 + $0x8] sm:$0xff pattern:$0x73625140]  ;;  %v407_v33 = vld.sshfl [vmem:[#allocation1 + $0x18] sm:$0xff pattern:$0x73625140] }
  0xa8   :  { %391 = vrot.lane.b32.xlu2 %v383_v18, %s617_s22  ;;  %389 = vrot.lane.b32.xlu1 %v381_v19, %s617_s22 }
  0xa9   :  { %v123_v25 = vpop.permute.xlu1 %122  ;;  %v121_v26 = vpop.permute.xlu0 %120 }
  0xaa   :  { %413 = vrot.lane.b32.xlu0 %v405_v24, %s618_s25  ;;  %v790_v31 = vpop.permute.xlu2 %168  ;;  %v129_v49 = vsel %vm128_vm1, %v121_v26, %v123_v25 }
  0xab   :  { %v223_v62 = vsel %vm197_vm3, %v107_v46, %v129_v49 }
  0xb0   :  { %393 = vrot.lane.b32.xlu2 %v385_v20, %s617_s22  ;;  %409 = vrot.lane.b32.xlu1 %v401_v28, %s618_s25  ;;  %v109_v28 = vsel %vm106_vm4, %v763_v14, %v777_v22 }
  0xb1   :  { %v787_v29 = vpop.permute.xlu1 %126 }
  0xb2   :  { %395 = vrot.lane.b32.xlu0 %v387_v17, %s617_s22  ;;  %v143_v30 = vpop.permute.xlu0 %142  ;;  %v796_v36 = vpop.permute.xlu2 %61  ;;  %v199_v17 = vsel %vm197_vm3, %v648_v2, %v747_v1  ;;  %v131_v1 = vsel %vm128_vm1, %v775_v21, %v787_v29 }
  0xb8   :  { %411 = vrot.lane.b32.xlu2 %v403_v32, %s618_s25  ;;  %415 = vrot.lane.b32.xlu1 %v407_v33, %s618_s25 }
  0xb9   :  { %v145_v34 = vpop.permute.xlu1 %144 }
  0xba   :  { %289 = vrot.lane.b32.xlu0 %v717_v47, %s612_s17  ;;  %v152_v54 = vsel %vm150_vm5, %v145_v34, %v782_v27 }
  0xbb   :  { %v165_v35 = vpop.permute.xlu0 %164 }
  0xbf   :  { %v804_v44 = vpop.permute.xlu2 %266 }
  0xc0   :  { %270 = vrot.lane.b32.xlu2 %v711_v43, %s611_s16  ;;  %268 = vrot.lane.b32.xlu1 %v709_v42, %s611_s16  ;;  %v43_v42 = vsel %vm41_vm0, %v743_v61, %v725_v50  ;;  %v108_v43 = vsel %vm106_vm4, %v753_v7, %v763_v14  ;;  %v64_v7 = vsel %vm63_vm7, %v757_v9, %v755_v8 }
  0xc1   :  { %v167_v37 = vpop.permute.xlu1 %166  ;;  %v201_v63 = vsel %vm197_vm3, %v650_v3, %v43_v42  ;;  %v87_v3 = vsel %vm85_vm8, %v767_v15, %v741_v60  ;;  %v206_v9 = vsel %vm204_vm9, %v199_v17, %v64_v7  ;;  %v66_v14 = vsel %vm63_vm7, %v734_v55, %v796_v36 }
  0xc2   :  { %312 = vrot.lane.b32.xlu0 %v730_v53, %s613_s18  ;;  %v151_v53 = vsel %vm150_vm5, %v143_v30, %v145_v34  ;;  %v173_v58 = vsel %vm172_vm6, %v165_v35, %v167_v37  ;;  %v174_v59 = vsel %vm172_vm6, %v167_v37, %v790_v31  ;;  %v208_v18 = vsel %vm204_vm9, %v201_v63, %v65_v6 }
  0xc3   :  { %v231_v0 = vsel %vm204_vm9, %v223_v62, %v151_v53  ;;  %v213_v20 = vsel %vm211_vm10, %v206_v9, %v86_v13  ;;  %v216_v23 = vsel %vm211_vm10, %v208_v18, %v87_v3  ;;  %v229_v30 = vsel %vm197_vm3, %v109_v28, %v131_v1 }
  0xc4   :  { %v186_v38 = vpop.permute.xlu0 %185  ;;  %v237_v11 = vsel %vm211_vm10, %v231_v0, %v173_v58 }
  0xc7   :  { %v84_v10 = vpop.permute.xlu2 %83 }
  0xc8   :  { %310 = vrot.lane.b32.xlu2 %v728_v52, %s613_s18  ;;  %291 = vrot.lane.b32.xlu1 %v721_v48, %s612_s17  ;;  %v130_v48 = vsel %vm128_vm1, %v123_v25, %v775_v21 }
  0xc9   :  { %v190_v45 = vpop.permute.xlu1 %189  ;;  %v226_v61 = vsel %vm197_vm3, %v108_v43, %v130_v48 }
  0xca   :  { %v233_v5 = vsel %vm204_vm9, %v226_v61, %v152_v54  ;;  %v466_v61 = vld [vmem:[%s995_s2] sm:$0xff] }
  0xcb   :  { %v240_v12 = vsel %vm211_vm10, %v233_v5, %v174_v59  ;;  %v619_v59 = vmov 0  }
  0xcc   :  { %v188_v47 = vpop.permute.xlu0 %187  ;;  %609 = vset.pattern.permute.xlu1 %v619_v59  ;;  %610 = vset.pattern.permute.xlu0 %v619_v59 }
  0xcd   :  { %v194_v51 = vsel %vm193_vm2, %v186_v38, %v188_v47  ;;  %v195_v52 = vsel %vm193_vm2, %v188_v47, %v190_v45 }
  0xce   :  { %v477_v56 = vsel %vm197_vm3, %v194_v51, 0  ;;  %v480_v57 = vsel %vm197_vm3, %v195_v52, 0 }
  0xcf   :  { %499 = vmatpush.bf16.msra.mxu0 %v477_v56  ;;  %512 = vmatpush.bf16.msra.mxu1 %v480_v57 }
  0xd0   :  { %469 = vperm.xlu1 %609, %v466_v61  }
  0xd3   :  { %500 = vmatpush.bf16.msra.mxu0 %v237_v11  ;;  %513 = vmatpush.bf16.msra.mxu1 %v240_v12 }
  0xd4   :  { %v192_v8 = vpop.permute.xlu0 %191 }
  0xd5   :  { %v196_v19 = vsel %vm193_vm2, %v190_v45, %v192_v8 }
  0xd6   :  { %v483_v24 = vsel %vm197_vm3, %v196_v19, 0 }
  0xd7   :  { %501 = vmatpush.bf16.msra.mxu0 %v213_v20  ;;  %514 = vmatpush.bf16.msra.mxu1 %v216_v23  ;;  %v862_v2 = vpop.permute.xlu1 %264 }
  0xd8   :  { %525 = vmatpush.bf16.msra.mxu2 %v483_v24  ;;  %v272_v24 = vsel %vm41_vm0, %v862_v2, %v804_v44 }
  0xda   :  { %v860_v15 = vpop.permute.xlu2 %326 }
  0xdc   :  { %v149_v16 = vpop.permute.xlu0 %148 }
  0xdd   :  { %v153_v25 = vsel %vm150_vm5, %v782_v27, %v149_v16 }
  0xde   :  { %v235_v34 = vsel %vm204_vm9, %v229_v30, %v153_v25  ;;  %v421_v30 = vsel %vm197_vm3, %v701_v39, %v272_v24 }
  0xe0   :  { %v878_v35 = vpop.permute.xlu1 %287 }
  0xe2   :  { %v869_v26 = vpop.permute.xlu2 %330 }
  0xe4   :  { %v171_v32 = vpop.permute.xlu0 %170 }
  0xe5   :  { %v175_v33 = vsel %vm172_vm6, %v790_v31, %v171_v32  ;;  %v88_v31 = vsel %vm85_vm8, %v741_v60, %v84_v10 }
  0xe6   :  { %v243_v21 = vsel %vm211_vm10, %v235_v34, %v175_v33 }
  0xe7   :  { %526 = vmatpush.bf16.msra.mxu2 %v243_v21 }
  0xe9   :  { %v891_v45 = vpop.permute.xlu1 %308 }
  0xea   :  { %v350_v27 = vpop.permute.xlu2 %349 }
  0xec   :  { %v40_v29 = vpop.permute.xlu0 %39 }
  0xed   :  { %v44_v37 = vsel %vm41_vm0, %v725_v50, %v40_v29 }
  0xee   :  { %v203_v22 = vsel %vm197_vm3, %v652_v4, %v44_v37  ;;  %v899_v4 = vld [vmem:[%s994_s1] sm:$0xf] }
  0xef   :  { %v210_v38 = vsel %vm204_vm9, %v203_v22, %v66_v14  ;;  %591 = vmatmul.msk.bf16.vlgmr.msra.gmra.mxu0 %vm472_vm11, %v899_v4  ;;  %592 = vmatmul.msk.bf16.vlgmr.msra.gmra.mxu1 %vm472_vm11, %v899_v4 }
  0xf0   :  { %v219_v42 = vsel %vm211_vm10, %v210_v38, %v88_v31 }
  0xf1   :  { %527 = vmatpush.bf16.msra.mxu2 %v219_v42 }
  0xf2   :  { %v894_v43 = vpop.permute.xlu2 %353 }
  0xf4   :  { %v286_v50 = vpop.permute.xlu0 %285  ;;  %593 = vmatmul.msk.bf16.vlgmr.msra.gmra.mxu2 %vm472_vm11, %v899_v4 }
  0xf5   :  { %v293_v16 = vsel %vm63_vm7, %v286_v50, %v878_v35 }
  0xf6   :  { %v427_v2 = vsel %vm204_vm9, %v421_v30, %v293_v16 }
  0xfa   :  { %v348_v46 = vpop.permute.xlu1 %347  ;;  %v371_v48 = vpop.permute.xlu2 %370 }
  0xfb   :  { %v355_v19 = vsel %vm128_vm1, %v348_v46, %v350_v27 }
  0xfc   :  { %v329_v47 = vpop.permute.xlu0 %328 }
  0xfd   :  { %v335_v57 = vsel %vm106_vm4, %v329_v47, %v869_v26  ;;  %v334_v13 = vsel %vm106_vm4, %v860_v15, %v329_v47 }
  0xfe   :  { %v443_v23 = vsel %vm197_vm3, %v334_v13, %v355_v19 }
 0x102   :  { %v352_v55 = vpop.permute.xlu1 %351  ;;  %v392_v49 = vpop.permute.xlu2 %391 }
 0x103   :  { %v356_v58 = vsel %vm128_vm1, %v350_v27, %v352_v55  ;;  %v357_v37 = vsel %vm128_vm1, %v352_v55, %v894_v43 }
 0x104   :  { %v307_v36 = vpop.permute.xlu0 %306  ;;  %v446_v6 = vsel %vm197_vm3, %v335_v57, %v356_v58 }
 0x105   :  { %v314_v28 = vsel %vm85_vm8, %v307_v36, %v891_v45 }
 0x106   :  { %v433_v27 = vsel %vm211_vm10, %v427_v2, %v314_v28 }
 0x10a   :  { %v369_v60 = vpop.permute.xlu1 %368  ;;  %v394_v52 = vpop.permute.xlu2 %393 }
 0x10b   :  { %v398_v10 = vsel %vm172_vm6, %v392_v49, %v394_v52  ;;  %v376_v8 = vsel %vm150_vm5, %v369_v60, %v371_v48 }
 0x10c   :  { %v333_v51 = vpop.permute.xlu0 %332  ;;  %v451_v15 = vsel %vm204_vm9, %v443_v23, %v376_v8 }
 0x10d   :  { %v336_v33 = vsel %vm106_vm4, %v869_v26, %v333_v51 }
 0x10e   :  { %v449_v26 = vsel %vm197_vm3, %v336_v33, %v357_v37 }
 0x112   :  { %v375_v53 = vpop.permute.xlu1 %374  ;;  %v412_v62 = vpop.permute.xlu2 %411 }
 0x114   :  { %v373_v54 = vpop.permute.xlu0 %372 }
 0x115   :  { %v377_v63 = vsel %vm150_vm5, %v371_v48, %v373_v54  ;;  %v378_v21 = vsel %vm150_vm5, %v373_v54, %v375_v53 }
 0x116   :  { %v453_v11 = vsel %vm204_vm9, %v446_v6, %v377_v63  ;;  %v455_v22 = vsel %vm204_vm9, %v449_v26, %v378_v21 }
 0x117   :  { %v460_v3 = vsel %vm211_vm10, %v453_v11, %v398_v10 }
 0x11a   :  { %v390_v56 = vpop.permute.xlu1 %389  ;;  %v271_v1 = vpop.permute.xlu2 %270 }
 0x11b   :  { %v397_v20 = vsel %vm172_vm6, %v390_v56, %v392_v49 }
 0x11c   :  { %v414_v0 = vpop.permute.xlu0 %413  ;;  %v457_v25 = vsel %vm211_vm10, %v451_v15, %v397_v20 }
 0x11d   :  { %v418_v5 = vsel %vm193_vm2, %v412_v62, %v414_v0 }
 0x11e   :  { %v489_v7 = vsel %vm197_vm3, %v418_v5, 0 }
 0x11f   :  { %551 = vmatpush.bf16.msrb.mxu0 %v489_v7 }
 0x122   :  { %v410_v12 = vpop.permute.xlu1 %409  ;;  %v311_v38 = vpop.permute.xlu2 %310 }
 0x123   :  { %v417_v17 = vsel %vm193_vm2, %v410_v12, %v412_v62  ;;  %552 = vmatpush.bf16.msrb.mxu0 %v460_v3  ;;  %v315_v47 = vsel %vm85_vm8, %v891_v45, %v311_v38 }
 0x124   :  { %v486_v9 = vsel %vm197_vm3, %v417_v17, 0  ;;  %v396_v18 = vpop.permute.xlu0 %395 }
 0x125   :  { %538 = vmatpush.bf16.msra.mxu3 %v486_v9  ;;  %v399_v14 = vsel %vm172_vm6, %v394_v52, %v396_v18 }
 0x126   :  { %v463_v31 = vsel %vm211_vm10, %v455_v22, %v399_v14 }
 0x129   :  { %539 = vmatpush.bf16.msra.mxu3 %v457_v25 }
 0x12a   :  { %v416_v32 = vpop.permute.xlu1 %415 }
 0x12b   :  { %v419_v34 = vsel %vm193_vm2, %v414_v0, %v416_v32 }
 0x12c   :  { %v492_v29 = vsel %vm197_vm3, %v419_v34, 0  ;;  %v290_v39 = vpop.permute.xlu0 %289 }
 0x12d   :  { %540 = vmatpush.bf16.msra.mxu3 %v433_v27  ;;  %564 = vmatpush.bf16.msrb.mxu1 %v492_v29  ;;  %v294_v42 = vsel %vm63_vm7, %v878_v35, %v290_v39 }
 0x130   :  { %594 = vmatmul.msk.bf16.vlgmr.msra.gmra.mxu3 %vm472_vm11, %v899_v4 }
 0x131   :  { %565 = vmatpush.bf16.msrb.mxu1 %v463_v31 }
 0x132   :  { %v269_v43 = vpop.permute.xlu1 %268 }
 0x133   :  { %v273_v50 = vsel %vm41_vm0, %v804_v44, %v269_v43  ;;  %v274_v49 = vsel %vm41_vm0, %v269_v43, %v271_v1 }
 0x134   :  { %v423_v46 = vsel %vm197_vm3, %v703_v40, %v273_v50  ;;  %v313_v36 = vpop.permute.xlu0 %312  ;;  %v425_v40 = vsel %vm197_vm3, %v705_v41, %v274_v49 }
 0x135   :  { %v429_v48 = vsel %vm204_vm9, %v423_v46, %v294_v42  ;;  %v316_v35 = vsel %vm85_vm8, %v311_v38, %v313_v36 }
 0x136   :  { %v436_v55 = vsel %vm211_vm10, %v429_v48, %v315_v47 }
 0x137   :  { %553 = vmatpush.bf16.msrb.mxu0 %v436_v55 }
 0x13a   :  { %v292_v60 = vpop.permute.xlu1 %291  ;;  %595 = vmatmul.msk.bf16.vlgmr.msrb.gmra.mxu0 %vm472_vm11, %v899_v4 }
 0x13b   :  { %v295_v44 = vsel %vm63_vm7, %v290_v39, %v292_v60 }
 0x13c   :  { %v431_v45 = vsel %vm204_vm9, %v425_v40, %v295_v44 }
 0x13d   :  { %v439_v51 = vsel %vm211_vm10, %v431_v45, %v316_v35 }
 0x13e   :  { %566 = vmatpush.bf16.msrb.mxu1 %v439_v51 }
 0x141   :  { %596 = vmatmul.msk.bf16.vlgmr.msrb.gmra.mxu1 %vm472_vm11, %v899_v4 }
 0x142   :  { %v470_v58 = vpop.permute.xlu1 %469 }
 0x16c   :  { %v503_v52 = vpop.f32.mrf.mxu0  ;;  %v516_v53 = vpop.f32.mrf.mxu1 }
 0x16d   :  { %v504_v59 = vadd.f32 %v503_v52, %v470_v58  ;;  %v517_v61 = vadd.f32 %v516_v53, %v470_v58 }
 0x16f   :  { %v572_v41 = vmax.f32 %v504_v59, 0.0  ;;  %v573_v63 = vmax.f32 %v517_v61, 0.0 }
 0x171   :  { %578 = vst [vmem:[%s996_s3] sm:$0xff] %v572_v41 }
 0x172   :  { %579 = vst [vmem:[%s996_s3 + $0x8] sm:$0xff] %v573_v63 }
 0x174   :  { %v505_v56 = vpop.f32.mrf.mxu0  ;;  %v518_v57 = vpop.f32.mrf.mxu1 }
 0x177   :  { %v529_v54 = vpop.f32.mrf.mxu2 }
 0x178   :  { %v530_v62 = vadd.f32 %v529_v54, %v470_v58 }
 0x17a   :  { %v574_v0 = vmax.f32 %v530_v62, 0.0 }
 0x17c   :  { %580 = vst [vmem:[%s996_s3 + $0x10] sm:$0xff] %v574_v0 }
 0x17f   :  { %v531_v4 = vpop.f32.mrf.mxu2 }
 0x1b3   :  { %v542_v5 = vpop.f32.mrf.mxu3 }
 0x1b4   :  { %v543_v6 = vadd.f32 %v542_v5, %v470_v58 }
 0x1b6   :  { %v575_v7 = vmax.f32 %v543_v6, 0.0 }
 0x1b7   :  { %v555_v10 = vpop.f32.mrf.mxu0 }
 0x1b8   :  { %597 = vst [vmem:[%s996_s3 + $0x18] sm:$0xff] %v575_v7  ;;  %v556_v11 = vadd.f32 %v555_v10, %v470_v58 }
 0x1ba   :  { %v576_v12 = vmax.f32 %v556_v11, 0.0 }
 0x1bb   :  { %v544_v3 = vpop.f32.mrf.mxu3 }
 0x1bc   :  { %598 = vst [vmem:[%s996_s3 + $0x20] sm:$0xff] %v576_v12 }
 0x1be   :  { %v568_v13 = vpop.f32.mrf.mxu1 }
 0x1bf   :  { %v569_v17 = vadd.f32 %v568_v13, %v470_v58  ;;  %v557_v8 = vpop.f32.mrf.mxu0 }
 0x1c1   :  { %v577_v9 = vmax.f32 %v569_v17, 0.0 }
 0x1c3   :  { %599 = vst [vmem:[%s996_s3 + $0x28] sm:$0xff] %v577_v9 }
 0x1c6   :  { %v570_v18 = vpop.f32.mrf.mxu1 }

</bundles_post_ra>
